<compile_context>
chip_gen: v6e
topology: v6e:2x2x1
jax: 0.10.0
libtpu: 0.0.40
codegen_flags: <defaults>
</compile_context>

<pallas_src>
import functools

import jax
import jax.numpy as jnp
from jax.experimental import pallas as pl
from jax.experimental.pallas import tpu as pltpu


VMEM_LIMIT = 48 * 1024 * 1024


def _round_up(x, m):
    return (x + m - 1) // m * m


# ----------------------------- Pallas kernels ------------------------------ #

def _conv_row_kernel(*refs, kh, kw, stride, n_ph, wo, relu, has_res):
    """Tap-accumulated convolution row.

    grid = (N, Ho, kh).  For grid point (n, ho, dh) the input specs deliver one
    padded input row (phase-split along W when stride == 2) at padded-H index
    stride*ho + dh.  The kernel runs kw small GEMMs (one per horizontal tap) on
    the MXU, accumulating into a float32 VMEM scratch; bias (+ residual)
    (+ ReLU) epilogue and the single HBM store happen on the last vertical tap.
    """
    n_in = n_ph + 2 + (1 if has_res else 0)
    x_refs = refs[:n_ph]
    w_ref, b_ref = refs[n_ph], refs[n_ph + 1]
    res_ref = refs[n_ph + 2] if has_res else None
    o_ref, acc_ref = refs[n_in], refs[n_in + 1]

    dh = pl.program_id(2)

    @pl.when(dh == 0)
    def _init():
        acc_ref[...] = jnp.zeros(acc_ref.shape, acc_ref.dtype)

    acc = None
    for dw in range(kw):
        ph, q = dw % stride, dw // stride
        xs = x_refs[ph][0, 0, pl.ds(q, wo), :]          # (wo, Cin)  bf16
        wt = w_ref[dh * kw + dw]                        # (Cin, Cout) bf16
        d = jnp.dot(xs, wt, preferred_element_type=jnp.float32)
        acc = d if acc is None else acc + d
    acc_ref[...] += acc

    @pl.when(dh == kh - 1)
    def _finalize():
        out = acc_ref[...] + b_ref[...]                 # f32 epilogue
        if has_res:
            out = out + res_ref[0, 0, :, :].astype(jnp.float32)
        if relu:
            out = jnp.maximum(out, 0.0)
        o_ref[0, 0, :, :] = out.astype(o_ref.dtype)


def _maxpool_row_kernel(*refs, kh, kw, stride, n_ph, wo):
    """3x3/s2 max-pool, same (image, output-row, vertical-tap) grid structure."""
    x_refs = refs[:n_ph]
    o_ref, acc_ref = refs[n_ph], refs[n_ph + 1]

    dh = pl.program_id(2)

    @pl.when(dh == 0)
    def _init():
        acc_ref[...] = jnp.full(acc_ref.shape, -jnp.inf, acc_ref.dtype)

    m = acc_ref[...]
    for dw in range(kw):
        ph, q = dw % stride, dw // stride
        m = jnp.maximum(m, x_refs[ph][0, 0, pl.ds(q, wo), :].astype(jnp.float32))
    acc_ref[...] = m

    @pl.when(dh == kh - 1)
    def _finalize():
        o_ref[0, 0, :, :] = acc_ref[...].astype(o_ref.dtype)


def _head_kernel(x_ref, w_ref, b_ref, o_ref, *, inv_hw):
    """Fused adaptive global average pool + Linear (lane-dense padded output)."""
    feat = jnp.sum(x_ref[...].astype(jnp.float32), axis=1) * inv_hw   # (bn, C)
    logits = jnp.dot(feat.astype(jnp.bfloat16), w_ref[...],
                     preferred_element_type=jnp.float32)
    o_ref[...] = logits + b_ref[...]


# ------------------------------ wrappers ------------------------------------ #

def _row_index_map(stride):
    return lambda n, ho, dh: (n, stride * ho + dh, 0, 0)


def _out_row_index_map(n, ho, dh):
    return (n, ho, 0, 0)


def conv2d_bn(x, p, *, stride, pad, relu, residual=None):
    """k x k conv (stride, pad) with folded BatchNorm, optional fused residual
    add + ReLU.  x: (N, H, W, Cin) bf16 NHWC -> (N, Ho, Wo, Cout) bf16."""
    N, H, W, cin = x.shape
    k = p['k']
    cout = p['w'].shape[-1]
    Ho = (H + 2 * pad - k) // stride + 1
    Wo = (W + 2 * pad - k) // stride + 1

    xp = jnp.pad(x, ((0, 0), (pad, pad), (pad, pad), (0, 0))) if pad else x
    n_ph = min(stride, k)
    if stride == 1:
        phases = [xp]
    else:  # even/odd column phases so the kernel only needs contiguous slices
        phases = [xp[:, :, ph::stride, :] for ph in range(n_ph)]

    in_specs = [pl.BlockSpec((1, 1, a.shape[2], cin), _row_index_map(stride))
                for a in phases]
    in_specs.append(pl.BlockSpec((k * k, cin, cout), lambda n, ho, dh: (0, 0, 0)))
    in_specs.append(pl.BlockSpec((1, cout), lambda n, ho, dh: (0, 0)))
    args = list(phases) + [p['w'], p['b']]

    has_res = residual is not None
    if has_res:
        in_specs.append(pl.BlockSpec((1, 1, Wo, cout), _out_row_index_map))
        args.append(residual)

    kernel = functools.partial(_conv_row_kernel, kh=k, kw=k, stride=stride,
                               n_ph=n_ph, wo=Wo, relu=relu, has_res=has_res)
    return pl.pallas_call(
        kernel,
        out_shape=jax.ShapeDtypeStruct((N, Ho, Wo, cout), jnp.bfloat16),
        grid=(N, Ho, k),
        in_specs=in_specs,
        out_specs=pl.BlockSpec((1, 1, Wo, cout), _out_row_index_map),
        scratch_shapes=[pltpu.VMEM((Wo, cout), jnp.float32)],
        compiler_params=pltpu.CompilerParams(
            dimension_semantics=("parallel", "parallel", "arbitrary"),
            vmem_limit_bytes=VMEM_LIMIT),
    )(*args)


def maxpool_3x3_s2(x):
    N, H, W, C = x.shape
    k, stride, pad = 3, 2, 1
    neg = float(jnp.finfo(x.dtype).min)
    xp = jnp.pad(x, ((0, 0), (pad, pad), (pad, pad), (0, 0)), constant_values=neg)
    Ho = (H + 2 * pad - k) // stride + 1
    Wo = (W + 2 * pad - k) // stride + 1
    n_ph = min(stride, k)
    phases = [xp[:, :, ph::stride, :] for ph in range(n_ph)]

    in_specs = [pl.BlockSpec((1, 1, a.shape[2], C), _row_index_map(stride))
                for a in phases]
    kernel = functools.partial(_maxpool_row_kernel, kh=k, kw=k, stride=stride,
                               n_ph=n_ph, wo=Wo)
    return pl.pallas_call(
        kernel,
        out_shape=jax.ShapeDtypeStruct((N, Ho, Wo, C), x.dtype),
        grid=(N, Ho, k),
        in_specs=in_specs,
        out_specs=pl.BlockSpec((1, 1, Wo, C), _out_row_index_map),
        scratch_shapes=[pltpu.VMEM((Wo, C), jnp.float32)],
        compiler_params=pltpu.CompilerParams(
            dimension_semantics=("parallel", "parallel", "arbitrary"),
            vmem_limit_bytes=VMEM_LIMIT),
    )(*phases)


def head_avgpool_fc(x, fc_w, fc_b, num_classes):
    """Adaptive avg-pool to 1x1 fused with the (128-lane padded) Linear head."""
    N, H, W, C = x.shape
    HW = H * W
    xf = x.reshape(N, HW, C)
    bn = 256 if N >= 256 else _round_up(N, 8)
    n_pad = _round_up(N, bn)
    if n_pad != N:
        xf = jnp.pad(xf, ((0, n_pad - N), (0, 0), (0, 0)))
    ncp = fc_w.shape[1]
    logits = pl.pallas_call(
        functools.partial(_head_kernel, inv_hw=1.0 / HW),
        out_shape=jax.ShapeDtypeStruct((n_pad, ncp), jnp.float32),
        grid=(n_pad // bn,),
        in_specs=[pl.BlockSpec((bn, HW, C), lambda i: (i, 0, 0)),
                  pl.BlockSpec((C, ncp), lambda i: (0, 0)),
                  pl.BlockSpec((1, ncp), lambda i: (0, 0))],
        out_specs=pl.BlockSpec((bn, ncp), lambda i: (i, 0)),
        compiler_params=pltpu.CompilerParams(
            dimension_semantics=("parallel",),
            vmem_limit_bytes=VMEM_LIMIT),
    )(xf, fc_w, fc_b)
    return logits[:N, :num_classes]


def basic_block(x, p):
    s = p['stride']
    if 'down' in p:
        identity = conv2d_bn(x, p['down'], stride=s, pad=0, relu=False)
    else:
        identity = x
    h = conv2d_bn(x, p['conv1'], stride=s, pad=1, relu=True)
    # residual add + ReLU fused into conv2's epilogue
    return conv2d_bn(h, p['conv2'], stride=1, pad=1, relu=True, residual=identity)


# --------------------------- Parameter creation ----------------------------- #

def make_conv_bn_params(key, cin, cout, k):
    kw_, kg, kb, km, kv = jax.random.split(key, 5)
    w = jax.random.normal(kw_, (cout, cin, k, k), jnp.float32) * 0.05   # OIHW
    gamma = jax.random.uniform(kg, (cout,), jnp.float32, 0.5, 1.5)
    beta = jax.random.normal(kb, (cout,), jnp.float32) * 0.1
    mean = jax.random.normal(km, (cout,), jnp.float32) * 0.1
    var = jax.random.uniform(kv, (cout,), jnp.float32, 0.5, 1.5)
    scale = gamma / jnp.sqrt(var + 1e-5)
    # Fold eval-mode BatchNorm into the conv (exact); layout (kh*kw, Cin, Cout).
    w_taps = (jnp.transpose(w, (2, 3, 1, 0)) * scale).reshape(k * k, cin, cout)
    bias = (beta - mean * scale).reshape(1, cout)
    return {'w': w_taps.astype(jnp.bfloat16), 'b': bias, 'k': k}


def init_resnet18_params(key, num_classes):
    keys = iter(jax.random.split(key, 64))
    params = {'conv1': make_conv_bn_params(next(keys), 3, 64, 7)}
    widths = [64, 128, 256, 512]
    in_c = 64
    layers = []
    for li, w in enumerate(widths):
        blocks = []
        for bi in range(2):
            stride = 2 if (li > 0 and bi == 0) else 1
            bp = {'conv1': make_conv_bn_params(next(keys), in_c, w, 3),
                  'conv2': make_conv_bn_params(next(keys), w, w, 3),
                  'stride': stride}
            if stride != 1 or in_c != w:
                bp['down'] = make_conv_bn_params(next(keys), in_c, w, 1)
            blocks.append(bp)
            in_c = w
        layers.append(blocks)
    params['layers'] = layers
    ncp = max(128, _round_up(num_classes, 128))       # lane-dense FC output
    kf1, kf2 = jax.random.split(next(keys))
    fc_w = jax.random.normal(kf1, (512, num_classes), jnp.float32) * 0.05
    fc_b = jax.random.normal(kf2, (1, num_classes), jnp.float32) * 0.05
    params['fc_w'] = jnp.pad(fc_w, ((0, 0), (0, ncp - num_classes))).astype(jnp.bfloat16)
    params['fc_b'] = jnp.pad(fc_b, ((0, 0), (0, ncp - num_classes)))
    params['num_classes'] = num_classes
    return params


# ------------------------------- Forward ------------------------------------ #

def clothing_model_forward(params, x_nchw):
    """ClothingModel('resnet18').forward — input NCHW, output (N, num_classes)."""
    x = jnp.transpose(x_nchw, (0, 2, 3, 1)).astype(jnp.bfloat16)    # NCHW -> NHWC
    x = conv2d_bn(x, params['conv1'], stride=2, pad=3, relu=True)   # stem
    x = maxpool_3x3_s2(x)
    for blocks in params['layers']:
        for bp in blocks:
            x = basic_block(x, bp)
    return head_avgpool_fc(x, params['fc_w'], params['fc_b'], params['num_classes'])


if __name__ == "__main__":
    num_classes = 10
    key = jax.random.PRNGKey(0)
    kx, kp = jax.random.split(key)
    x = jax.random.normal(kx, (2, 3, 32, 32), jnp.float32)          # NCHW like PyTorch
    params = init_resnet18_params(kp, num_classes)

    logits = clothing_model_forward(params, x)
    logits = jax.block_until_ready(logits)
    assert logits.shape == (2, num_classes) and logits.dtype == jnp.float32
    print("KERNEL_OK")
</pallas_src>

<mosaic_0001>
module attributes {stable_mosaic.version = 11 : i64} {
  func.func @_conv_row_kernel(%arg0: i32, %arg1: i32, %arg2: i32, %arg3: memref<1x1x19x3xbf16, #tpu.memory_space<vmem>>, %arg4: memref<1x1x19x3xbf16, #tpu.memory_space<vmem>>, %arg5: memref<49x3x64xbf16, #tpu.memory_space<vmem>>, %arg6: memref<1x64xf32, #tpu.memory_space<vmem>>, %arg7: memref<1x1x16x64xbf16, #tpu.memory_space<vmem>>, %arg8: memref<16x64xf32, #tpu.memory_space<vmem>>) attributes {dimension_semantics = [#tpu.dimension_semantics<parallel>, #tpu.dimension_semantics<parallel>, #tpu.dimension_semantics<arbitrary>], iteration_bounds = array<i64: 2, 16, 7>, scalar_prefetch = 0 : i64, scratch_operands = 1 : i64, tpu.core_type = #tpu.core_type<tc>, window_params = [{transform_indices = @transform_0, window_bounds = array<i64: 1, 1, 19, 3>}, {transform_indices = @transform_1, window_bounds = array<i64: 1, 1, 19, 3>}, {pipeline_mode = #tpu.pipeline_mode<synchronous>, transform_indices = @transform_2, window_bounds = array<i64: 49, 3, 64>}, {pipeline_mode = #tpu.pipeline_mode<synchronous>, transform_indices = @transform_3, window_bounds = array<i64: 1, 64>}, {transform_indices = @transform_4, window_bounds = array<i64: 1, 1, 16, 64>}]} {
    %c0_i32 = arith.constant 0 : i32
    %0 = arith.cmpi eq, %arg2, %c0_i32 : i32
    %1 = arith.extui %0 : i1 to i32
    %c0_i32_0 = arith.constant 0 : i32
    %2 = arith.cmpi ne, %1, %c0_i32_0 : i32
    scf.if %2 {
      %cst_58 = arith.constant 0.000000e+00 : f32
      %71 = vector.broadcast %cst_58 : f32 to vector<16x64xf32>
      %c0_59 = arith.constant 0 : index
      %c0_60 = arith.constant 0 : index
      %72 = vector.load %arg8[%c0_59, %c0_60] : memref<16x64xf32, #tpu.memory_space<vmem>>, vector<16x64xf32>
      tpu.vector_store %arg8[%c0_59, %c0_60], %71 {strides = array<i32>} : memref<16x64xf32, #tpu.memory_space<vmem>>, vector<16x64xf32>,
    } else {
    }
    %c0 = arith.constant 0 : index
    %c0_1 = arith.constant 0 : index
    %c0_2 = arith.constant 0 : index
    %c0_3 = arith.constant 0 : index
    %3 = vector.load %arg3[%c0, %c0_1, %c0_2, %c0_3] : memref<1x1x19x3xbf16, #tpu.memory_space<vmem>>, vector<1x1x16x3xbf16>
    %4 = vector.shape_cast %3 : vector<1x1x16x3xbf16> to vector<16x3xbf16>
    %c7_i32 = arith.constant 7 : i32
    %5 = arith.muli %arg2, %c7_i32 : i32
    %c0_i32_4 = arith.constant 0 : i32
    %6 = arith.addi %5, %c0_i32_4 : i32
    %7 = arith.index_cast %6 : i32 to index
    %c0_5 = arith.constant 0 : index
    %c0_6 = arith.constant 0 : index
    %8 = vector.load %arg5[%7, %c0_5, %c0_6] : memref<49x3x64xbf16, #tpu.memory_space<vmem>>, vector<1x3x64xbf16>
    %9 = vector.shape_cast %8 : vector<1x3x64xbf16> to vector<3x64xbf16>
    %cst = arith.constant dense<0.000000e+00> : vector<16x64xf32>
    %10 = tpu.matmul %4, %9, %cst {dimension_numbers = #tpu.dot_dimension_numbers<[1], [0], [0], [1], [0, 0, 1, 1], [], []>} : vector<16x3xbf16>, vector<3x64xbf16>, vector<16x64xf32> -> vector<16x64xf32>
    %c0_7 = arith.constant 0 : index
    %c0_8 = arith.constant 0 : index
    %c0_9 = arith.constant 0 : index
    %c0_10 = arith.constant 0 : index
    %11 = vector.load %arg4[%c0_7, %c0_8, %c0_9, %c0_10] : memref<1x1x19x3xbf16, #tpu.memory_space<vmem>>, vector<1x1x16x3xbf16>
    %12 = vector.shape_cast %11 : vector<1x1x16x3xbf16> to vector<16x3xbf16>
    %c7_i32_11 = arith.constant 7 : i32
    %13 = arith.muli %arg2, %c7_i32_11 : i32
    %c1_i32 = arith.constant 1 : i32
    %14 = arith.addi %13, %c1_i32 : i32
    %15 = arith.index_cast %14 : i32 to index
    %c0_12 = arith.constant 0 : index
    %c0_13 = arith.constant 0 : index
    %16 = vector.load %arg5[%15, %c0_12, %c0_13] : memref<49x3x64xbf16, #tpu.memory_space<vmem>>, vector<1x3x64xbf16>
    %17 = vector.shape_cast %16 : vector<1x3x64xbf16> to vector<3x64xbf16>
    %cst_14 = arith.constant dense<0.000000e+00> : vector<16x64xf32>
    %18 = tpu.matmul %12, %17, %cst_14 {dimension_numbers = #tpu.dot_dimension_numbers<[1], [0], [0], [1], [0, 0, 1, 1], [], []>} : vector<16x3xbf16>, vector<3x64xbf16>, vector<16x64xf32> -> vector<16x64xf32>
    %19 = arith.addf %10, %18 : vector<16x64xf32>
    %c0_15 = arith.constant 0 : index
    %c0_16 = arith.constant 0 : index
    %c1 = arith.constant 1 : index
    %c0_17 = arith.constant 0 : index
    %20 = vector.load %arg3[%c0_15, %c0_16, %c1, %c0_17] : memref<1x1x19x3xbf16, #tpu.memory_space<vmem>>, vector<1x1x16x3xbf16>
    %21 = vector.shape_cast %20 : vector<1x1x16x3xbf16> to vector<16x3xbf16>
    %c7_i32_18 = arith.constant 7 : i32
    %22 = arith.muli %arg2, %c7_i32_18 : i32
    %c2_i32 = arith.constant 2 : i32
    %23 = arith.addi %22, %c2_i32 : i32
    %24 = arith.index_cast %23 : i32 to index
    %c0_19 = arith.constant 0 : index
    %c0_20 = arith.constant 0 : index
    %25 = vector.load %arg5[%24, %c0_19, %c0_20] : memref<49x3x64xbf16, #tpu.memory_space<vmem>>, vector<1x3x64xbf16>
    %26 = vector.shape_cast %25 : vector<1x3x64xbf16> to vector<3x64xbf16>
    %cst_21 = arith.constant dense<0.000000e+00> : vector<16x64xf32>
    %27 = tpu.matmul %21, %26, %cst_21 {dimension_numbers = #tpu.dot_dimension_numbers<[1], [0], [0], [1], [0, 0, 1, 1], [], []>} : vector<16x3xbf16>, vector<3x64xbf16>, vector<16x64xf32> -> vector<16x64xf32>
    %28 = arith.addf %19, %27 : vector<16x64xf32>
    %c0_22 = arith.constant 0 : index
    %c0_23 = arith.constant 0 : index
    %c1_24 = arith.constant 1 : index
    %c0_25 = arith.constant 0 : index
    %29 = vector.load %arg4[%c0_22, %c0_23, %c1_24, %c0_25] : memref<1x1x19x3xbf16, #tpu.memory_space<vmem>>, vector<1x1x16x3xbf16>
    %30 = vector.shape_cast %29 : vector<1x1x16x3xbf16> to vector<16x3xbf16>
    %c7_i32_26 = arith.constant 7 : i32
    %31 = arith.muli %arg2, %c7_i32_26 : i32
    %c3_i32 = arith.constant 3 : i32
    %32 = arith.addi %31, %c3_i32 : i32
    %33 = arith.index_cast %32 : i32 to index
    %c0_27 = arith.constant 0 : index
    %c0_28 = arith.constant 0 : index
    %34 = vector.load %arg5[%33, %c0_27, %c0_28] : memref<49x3x64xbf16, #tpu.memory_space<vmem>>, vector<1x3x64xbf16>
    %35 = vector.shape_cast %34 : vector<1x3x64xbf16> to vector<3x64xbf16>
    %cst_29 = arith.constant dense<0.000000e+00> : vector<16x64xf32>
    %36 = tpu.matmul %30, %35, %cst_29 {dimension_numbers = #tpu.dot_dimension_numbers<[1], [0], [0], [1], [0, 0, 1, 1], [], []>} : vector<16x3xbf16>, vector<3x64xbf16>, vector<16x64xf32> -> vector<16x64xf32>
    %37 = arith.addf %28, %36 : vector<16x64xf32>
    %c0_30 = arith.constant 0 : index
    %c0_31 = arith.constant 0 : index
    %c2 = arith.constant 2 : index
    %c0_32 = arith.constant 0 : index
    %38 = vector.load %arg3[%c0_30, %c0_31, %c2, %c0_32] : memref<1x1x19x3xbf16, #tpu.memory_space<vmem>>, vector<1x1x16x3xbf16>
    %39 = vector.shape_cast %38 : vector<1x1x16x3xbf16> to vector<16x3xbf16>
    %c7_i32_33 = arith.constant 7 : i32
    %40 = arith.muli %arg2, %c7_i32_33 : i32
    %c4_i32 = arith.constant 4 : i32
    %41 = arith.addi %40, %c4_i32 : i32
    %42 = arith.index_cast %41 : i32 to index
    %c0_34 = arith.constant 0 : index
    %c0_35 = arith.constant 0 : index
    %43 = vector.load %arg5[%42, %c0_34, %c0_35] : memref<49x3x64xbf16, #tpu.memory_space<vmem>>, vector<1x3x64xbf16>
    %44 = vector.shape_cast %43 : vector<1x3x64xbf16> to vector<3x64xbf16>
    %cst_36 = arith.constant dense<0.000000e+00> : vector<16x64xf32>
    %45 = tpu.matmul %39, %44, %cst_36 {dimension_numbers = #tpu.dot_dimension_numbers<[1], [0], [0], [1], [0, 0, 1, 1], [], []>} : vector<16x3xbf16>, vector<3x64xbf16>, vector<16x64xf32> -> vector<16x64xf32>
    %46 = arith.addf %37, %45 : vector<16x64xf32>
    %c0_37 = arith.constant 0 : index
    %c0_38 = arith.constant 0 : index
    %c2_39 = arith.constant 2 : index
    %c0_40 = arith.constant 0 : index
    %47 = vector.load %arg4[%c0_37, %c0_38, %c2_39, %c0_40] : memref<1x1x19x3xbf16, #tpu.memory_space<vmem>>, vector<1x1x16x3xbf16>
    %48 = vector.shape_cast %47 : vector<1x1x16x3xbf16> to vector<16x3xbf16>
    %c7_i32_41 = arith.constant 7 : i32
    %49 = arith.muli %arg2, %c7_i32_41 : i32
    %c5_i32 = arith.constant 5 : i32
    %50 = arith.addi %49, %c5_i32 : i32
    %51 = arith.index_cast %50 : i32 to index
    %c0_42 = arith.constant 0 : index
    %c0_43 = arith.constant 0 : index
    %52 = vector.load %arg5[%51, %c0_42, %c0_43] : memref<49x3x64xbf16, #tpu.memory_space<vmem>>, vector<1x3x64xbf16>
    %53 = vector.shape_cast %52 : vector<1x3x64xbf16> to vector<3x64xbf16>
    %cst_44 = arith.constant dense<0.000000e+00> : vector<16x64xf32>
    %54 = tpu.matmul %48, %53, %cst_44 {dimension_numbers = #tpu.dot_dimension_numbers<[1], [0], [0], [1], [0, 0, 1, 1], [], []>} : vector<16x3xbf16>, vector<3x64xbf16>, vector<16x64xf32> -> vector<16x64xf32>
    %55 = arith.addf %46, %54 : vector<16x64xf32>
    %c0_45 = arith.constant 0 : index
    %c0_46 = arith.constant 0 : index
    %c3 = arith.constant 3 : index
    %c0_47 = arith.constant 0 : index
    %56 = vector.load %arg3[%c0_45, %c0_46, %c3, %c0_47] : memref<1x1x19x3xbf16, #tpu.memory_space<vmem>>, vector<1x1x16x3xbf16>
    %57 = vector.shape_cast %56 : vector<1x1x16x3xbf16> to vector<16x3xbf16>
    %c7_i32_48 = arith.constant 7 : i32
    %58 = arith.muli %arg2, %c7_i32_48 : i32
    %c6_i32 = arith.constant 6 : i32
    %59 = arith.addi %58, %c6_i32 : i32
    %60 = arith.index_cast %59 : i32 to index
    %c0_49 = arith.constant 0 : index
    %c0_50 = arith.constant 0 : index
    %61 = vector.load %arg5[%60, %c0_49, %c0_50] : memref<49x3x64xbf16, #tpu.memory_space<vmem>>, vector<1x3x64xbf16>
    %62 = vector.shape_cast %61 : vector<1x3x64xbf16> to vector<3x64xbf16>
    %cst_51 = arith.constant dense<0.000000e+00> : vector<16x64xf32>
    %63 = tpu.matmul %57, %62, %cst_51 {dimension_numbers = #tpu.dot_dimension_numbers<[1], [0], [0], [1], [0, 0, 1, 1], [], []>} : vector<16x3xbf16>, vector<3x64xbf16>, vector<16x64xf32> -> vector<16x64xf32>
    %64 = arith.addf %55, %63 : vector<16x64xf32>
    %c0_52 = arith.constant 0 : index
    %c0_53 = arith.constant 0 : index
    %65 = vector.load %arg8[%c0_52, %c0_53] : memref<16x64xf32, #tpu.memory_space<vmem>>, vector<16x64xf32>
    %66 = arith.addf %65, %64 : vector<16x64xf32>
    %c0_54 = arith.constant 0 : index
    %c0_55 = arith.constant 0 : index
    %67 = vector.load %arg8[%c0_54, %c0_55] : memref<16x64xf32, #tpu.memory_space<vmem>>, vector<16x64xf32>
    tpu.vector_store %arg8[%c0_54, %c0_55], %66 {strides = array<i32>} : memref<16x64xf32, #tpu.memory_space<vmem>>, vector<16x64xf32>,
    %c6_i32_56 = arith.constant 6 : i32
    %68 = arith.cmpi eq, %arg2, %c6_i32_56 : i32
    %69 = arith.extui %68 : i1 to i32
    %c0_i32_57 = arith.constant 0 : i32
    %70 = arith.cmpi ne, %69, %c0_i32_57 : i32
    scf.if %70 {
      %c0_58 = arith.constant 0 : index
      %c0_59 = arith.constant 0 : index
      %71 = vector.load %arg8[%c0_58, %c0_59] : memref<16x64xf32, #tpu.memory_space<vmem>>, vector<16x64xf32>
      %c0_60 = arith.constant 0 : index
      %c0_61 = arith.constant 0 : index
      %72 = vector.load %arg6[%c0_60, %c0_61] : memref<1x64xf32, #tpu.memory_space<vmem>>, vector<1x64xf32>
      %73 = vector.broadcast %72 : vector<1x64xf32> to vector<16x64xf32>
      %74 = arith.addf %71, %73 : vector<16x64xf32>
      %cst_62 = arith.constant 0.000000e+00 : f32
      %75 = vector.broadcast %cst_62 : f32 to vector<16x64xf32>
      %76 = arith.maximumf %74, %75 : vector<16x64xf32>
      %77 = arith.truncf %76 : vector<16x64xf32> to vector<16x64xbf16>
      %c0_63 = arith.constant 0 : index
      %c0_64 = arith.constant 0 : index
      %c0_65 = arith.constant 0 : index
      %c0_66 = arith.constant 0 : index
      %78 = vector.load %arg7[%c0_63, %c0_64, %c0_65, %c0_66] : memref<1x1x16x64xbf16, #tpu.memory_space<vmem>>, vector<1x1x16x64xbf16>
      %79 = vector.shape_cast %78 : vector<1x1x16x64xbf16> to vector<16x64xbf16>
      %80 = vector.shape_cast %77 : vector<16x64xbf16> to vector<1x1x16x64xbf16>
      tpu.vector_store %arg7[%c0_63, %c0_64, %c0_65, %c0_66], %80 {strides = array<i32>} : memref<1x1x16x64xbf16, #tpu.memory_space<vmem>>, vector<1x1x16x64xbf16>,
    } else {
    }
    return
  }
  func.func @transform_0(%arg0: i32, %arg1: i32, %arg2: i32) -> (i32, i32, i32, i32) {
    %c2_i32 = arith.constant 2 : i32
    %0 = arith.muli %c2_i32, %arg1 : i32
    %1 = arith.addi %0, %arg2 : i32
    %c0_i32 = arith.constant 0 : i32
    %c0_i32_0 = arith.constant 0 : i32
    %c0_i32_1 = arith.constant 0 : i32
    return %arg0, %1, %c0_i32, %c0_i32_0 : i32, i32, i32, i32
  }
  func.func @transform_1(%arg0: i32, %arg1: i32, %arg2: i32) -> (i32, i32, i32, i32) {
    %c2_i32 = arith.constant 2 : i32
    %0 = arith.muli %c2_i32, %arg1 : i32
    %1 = arith.addi %0, %arg2 : i32
    %c0_i32 = arith.constant 0 : i32
    %c0_i32_0 = arith.constant 0 : i32
    %c0_i32_1 = arith.constant 0 : i32
    return %arg0, %1, %c0_i32, %c0_i32_0 : i32, i32, i32, i32
  }
  func.func @transform_2(%arg0: i32, %arg1: i32, %arg2: i32) -> (i32, i32, i32) {
    %c0_i32 = arith.constant 0 : i32
    %c0_i32_0 = arith.constant 0 : i32
    %c0_i32_1 = arith.constant 0 : i32
    %c0_i32_2 = arith.constant 0 : i32
    return %c0_i32, %c0_i32_0, %c0_i32_1 : i32, i32, i32
  }
  func.func @transform_3(%arg0: i32, %arg1: i32, %arg2: i32) -> (i32, i32) {
    %c0_i32 = arith.constant 0 : i32
    %c0_i32_0 = arith.constant 0 : i32
    %c0_i32_1 = arith.constant 0 : i32
    return %c0_i32, %c0_i32_0 : i32, i32
  }
  func.func @transform_4(%arg0: i32, %arg1: i32, %arg2: i32) -> (i32, i32, i32, i32) {
    %c0_i32 = arith.constant 0 : i32
    %c0_i32_0 = arith.constant 0 : i32
    %c0_i32_1 = arith.constant 0 : i32
    return %arg0, %arg1, %c0_i32, %c0_i32_0 : i32, i32, i32, i32
  }
}

</mosaic_0001>

<bundles_post_ra>
// kernel: tpu_custom_call.1
= control target key start
LH: loop header
LB: loop body
LE: loop exit
PB: predicated region body
PF: predicated region fallthrough
CT: control target
= control target key end

     0   :  { %9 = vsyncpa [#allocation4], 0  ;;  %s1567_s0 = inlined_call_operand.vmem [shape: bf16[2,38,19,3], index: 0, kind: input, shape index: {}]   ;;  %s1568_s1 = inlined_call_operand.vmem [shape: bf16[2,38,19,3], index: 1, kind: input, shape index: {}]   ;;  %s1569_s2 = inlined_call_operand.vmem [shape: bf16[49,3,64], index: 2, kind: input, shape index: {}]   ;;  %s1570_s3 = inlined_call_operand.vmem [shape: f32[1,64], index: 3, kind: input, shape index: {}]   ;;  %s1571_s4 = inlined_call_operand.hbm [shape: bf16[2,16,16,64], index: 4, kind: output, shape index: {}]  }
   0x1   :  { %11 = vsyncpa [#allocation4 + $0x1], 0  ;;  %s1319_s15 = smov 0   ;;  %s1321_s16 = smov 0  }
   0x2   :  { %s1323_s17 = smov 0   ;;  %s1325_s18 = smov 0  }
   0x3   :  { %s1327_s19 = smov 0   ;;  %s1329_s20 = smov 0  }
   0x4   :  { %s1331_s21 = smov 0   ;;  %s1333_s22 = smov 0  }
   0x5   :  { %s1335_s23 = smov 0   ;;  %s1337_s24 = smov 0  }
   0x6 LB: > { %1577 = sst [smem:[#allocation6_spill]] %s1277_s22  ;;  %s960_s25 = sadd.s32 4294967295, %s1285_s24   ;;  %s1285_s24 = sphi %s1337_s24, %s17_s24   ;;  %s1281_s23 = sphi %s1335_s23, %s1589_s23   ;;  %s1277_s22 = sphi %s1333_s22, %s1588_s22   ;;  %s1273_s21 = sphi %s1331_s21, %s1594_s21   ;;  %s1269_s20 = sphi %s1329_s20, %s1586_s20   ;;  %s1265_s19 = sphi %s1327_s19, %s1585_s19   ;;  %s1261_s18 = sphi %s1325_s18, %s1593_s18   ;;  %s1257_s17 = sphi %s1323_s17, %s1592_s17   ;;  %s1253_s16 = sphi %s1321_s16, %s1591_s16   ;;  %s1249_s15 = sphi %s1319_s15, %s1590_s15  }
   0x7   : > { %1578 = sst [smem:[#allocation7_spill]] %s1281_s23  ;;  %s961_s26 = sadd.s32 4294967294, %s1285_s24  }
   0x8   : > { %s29_s27 = sadd.s32 1, %s1273_s21  ;;  %s32_s28 = sadd.s32 1, %s1277_s22 }
   0x9   : > { %p30_p0 = scmp.ge.s32.totalorder %s29_s27, 7  ;;  %s36_s29 = sadd.s32 1, %s1281_s23 }
   0xa   : > { %p161_p1 = scmp.ne.s32.totalorder %s1257_s17, %s1253_s16  ;;  %p162_p2 = scmp.eq.s32.totalorder %s960_s25, 223 }
   0xb   : > { %s1596_s27 = smov (%p30_p0, %s29_s27), 0  ;;  %s1598_s28 = smov (!%p30_p0, %s32_s28), %s1277_s22 }
   0xc   : > { %1579 = sst [smem:[#allocation8_spill]] %s1596_s27  ;;  %p167_p3 = scmp.ne.s32.totalorder %s1253_s16, %s1249_s15 }
   0xd   : > { %p34_p4 = scmp.ge.s32.totalorder %s1598_s28, 16  ;;  %p168_p5 = scmp.eq.s32.totalorder %s961_s26, 223 }
   0xe   : > { %p1381_p6 = por %p162_p2, %p161_p1  ;;  %p968_p8 = scmp.ge.s32.totalorder %s1285_s24, 1 }
   0xf   : > { %s1600_s28 = smov (%p34_p4, %s1598_s28), 0  ;;  %s1602_s29 = smov (!%p34_p4, %s36_s29), %s1281_s23 }
  0x10   : > { %1581 = sst [smem:[#allocation9_spill]] %s1600_s28  ;;  %p1388_p7 = por %p168_p5, %p167_p3 }
  0x11   : > { %p38_p9 = scmp.ge.s32.totalorder %s1602_s29, 2  ;;  %p224_p10 = scmp.lt.s32.totalorder %s1285_s24, 225 }
  0x12   : > { %s147_s6 = ssub.s32 %s1277_s22, %s1600_s28  ;;  %s151_s9 = sadd.s32 1, %s1257_s17 }
  0x13   : > { %s1604_s29 = smov (%p38_p9, %s1602_s29), 0  ;;  %p225_p11 = pnand %p968_p8, %p224_p10 }
  0x14   : > { %1583 = sst [smem:[#allocation10_spill]] %s1604_s29  ;;  %s146_s7 = ssub.s32 %s1281_s23, %s1604_s29 }
  0x15   : > { %s148_s8 = sor.u32 %s147_s6, %s146_s7  ;;  %228 = sbr.rel (%p225_p11) target bundleno = 313 (0x139), region = 36 }
  0x16   : > { %p149_p12 = scmp.eq.s32.totalorder %s148_s8, 0  ;;  %s1576_s11 = sand.u32 (!%p225_p11), 1, %s1253_s16  }
  0x17   : > { %s970_s12 = sshll.u32 (!%p225_p11), %s1265_s19, 1  ;;  %s969_s13 = sshll.u32 (!%p225_p11), %s1576_s11, 3 }
  0x18   : > { %s1402_s10 = scalar_select %p149_p12, %s1257_s17, %s151_s9  }
  0x19   : > { %s268_s14 = sadd.s32 (!%p225_p11), %s1261_s18, %s970_s12  ;;  %p269_p13 = scmp.lt.s32.totalorder (!%p225_p11), %s1269_s20, 1 }
  0x1a   : > { %p271_p0 = scmp.lt.s32.totalorder %s268_s14, 37  ;;  %s1423_s11 = scalar_lea.vmem [#allocation3], %s969_s13 }
  0x1b   : > { %s270_s25 = scalar_select %p269_p13, %s1269_s20, 1 }
  0x1c   : > { %s1606_s14 = smov (!%p271_p0, %s268_s14), 37  ;;  %p974_p1 = scmp.ne.s32.totalorder %s1261_s18, 0 }
  0x1d   : > { %s1074_s26 = smul.u32 114, %s270_s25 }
  0x1e   : > { %s1073_s6 = smul.u32 3, %s1606_s14 }
  0x1f   : > { %297 = sbr.rel (%p974_p1) target bundleno = 38 (0x26), region = 40 }
  0x20   : > { %s275_s7 = sadd.s32 %s1074_s26, %s1073_s6 }
  0x21   : > { %s971_s8 = sshll.u32 %s275_s7, 2 }
  0x22   : > { %s1416_s28 = scalar_lea.vmem %s1567_s0, %s971_s8  ;;  %s1421_s22 = scalar_lea.vmem %s1568_s1, %s971_s8 }
  0x24   : > { %vm298_vm0 = vcmask 523264   ;;  %v1287_v0 = vmov 0.0  }
  0x25   : > { %299 = vst.msk [vmem:[#allocation2] sm:$0xff] %vm298_vm0, %v1287_v0  ;;  %300 = vst.msk [vmem:[#allocation2 + $0x8] sm:$0xff] %vm298_vm0, %v1287_v0 }
  0x26 PF: > { %s1014_s29 = smul.u32 14, %s1261_s18  ;;  %vm322_vm1 = vcmask 1040384   ;;  %vm323_vm2 = vcmask 1041408   ;;  %v1288_v1 = vmov 0.0   ;;  %v1289_v2 = vmov 65535   ;;  %v1168_v7 = vld [vmem:[%s1421_s22] sm:$0xff]  }
  0x27   : > { %1031 = vmatprep.subr.bf16.mxu0 %v1288_v1  ;;  %1037 = vmatprep.subr.bf16.mxu1 %v1288_v1  ;;  %v324_v3 = vsel %vm322_vm1, 4294967295, %v1289_v2  ;;  %vm1290_vm3 = vmmov 0   ;;  %v422_v12 = vld [vmem:[%s1416_s28] sm:$0xf]  ;;  %v423_v14 = vld [vmem:[%s1416_s28 + $0x4] sm:$0xf] }
  0x28   : > { %s1432_s13 = scalar_lea.vmem %s1569_s2, %s1014_s29  ;;  %v1434_v4 = vsel %vm323_vm2, %v324_v3, 0  ;;  %1033 = vmatprep.mubr.msk.bf16.mxu0 %vm1290_vm3, %v1288_v1  ;;  %1039 = vmatprep.mubr.msk.bf16.mxu1 %vm1290_vm3, %v1288_v1  ;;  %v1169_v13 = vld [vmem:[%s1416_s28] sm:$0xff]   ;;  %vm318_vm4 = vcmask 23552   ;;  %v984_v17 = vcombine.low %v422_v12, %v423_v14  ;;  %v1171_v18 = vld [vmem:[%s1416_s28 + $0x8] ss:$0 sps:$4 sm:$0x11]  }
  0x29   : > { %v977_v5 = vld [vmem:[%s1432_s13 + $0x2] sm:$0x3]  ;;  %v306_v6 = vld [vmem:[%s1432_s13] sm:$0x3]  ;;  %v983_v10 = vld [vmem:[%s1432_s13 + $0x4] sm:$0x3] }
  0x2a   : > { %v327_v8 = vand.u32 %v977_v5, %v1434_v4  ;;  %v379_v9 = vand.u32 %v1434_v4, %v306_v6  ;;  %v988_v11 = vld [vmem:[%s1432_s13 + $0x6] sm:$0x3]  ;;  %v454_v15 = vand.u32 %v983_v10, %v1434_v4  ;;  %v499_v19 = vld [vmem:[%s1421_s22] sm:$0xf]  ;;  %v439_v21 = vshrl.u32 %v984_v17, 16  ;;  %p1004_p2 = scmp.ne.s32.totalorder %s1261_s18, 6 }
  0x2b   : > { %v530_v16 = vand.u32 %v988_v11, %v1434_v4  ;;  %v500_v20 = vld [vmem:[%s1421_s22 + $0x4] sm:$0xf]  ;;  %v441_v22 = vshll.u32 %v984_v17, 16  ;;  %v446_v23 = vshll.u32 %v1171_v18, 16  ;;  %vm437_vm5 = vsmask.f32 7424 }
  0x2c   : > { %1032 = vmatpush3.bf16.msra.mxu0 %v327_v8  ;;  %1038 = vmatpush3.bf16.msra.mxu1 %v379_v9  ;;  %v989_v24 = vcombine.low %v499_v19, %v500_v20  ;;  %v1173_v25 = vld [vmem:[%s1421_s22 + $0x8] ss:$0 sps:$4 sm:$0x11]   ;;  %v575_v27 = vld [vmem:[%s1416_s28] sm:$0xe]  ;;  %vm583_vm6 = vcmask 1046528  }
  0x2d   : > { %1043 = vmatprep.subr.bf16.mxu0 %v1288_v1  ;;  %1049 = vmatprep.subr.bf16.mxu1 %v1288_v1  ;;  %v993_v26 = vld [vmem:[%s1432_s13 + $0x8] sm:$0x3]  ;;  %v443_v28 = vrot.slane %v441_v22, 1  ;;  %v448_v29 = vrot.slane %v446_v23, 1  ;;  %v636_v32 = vld [vmem:[%s1421_s22] sm:$0xe]  ;;  %v994_v38 = vcombine.low %v575_v27, %v423_v14 }
  0x2e   : > { %v515_v30 = vshrl.u32 %v989_v24, 16  ;;  %v517_v31 = vshll.u32 %v989_v24, 16  ;;  %v522_v33 = vshll.u32 %v1173_v25, 16  ;;  %v997_v34 = vld [vmem:[%s1432_s13 + $0xa] sm:$0x3]  ;;  %v998_v39 = vcombine.low %v636_v32, %v500_v20 }
  0x2f   : > { %1034 = vmatmul.mubr.msk.bf16.vlgmr.msra.gmra.mxu0 %vm318_vm4, %v1168_v7  ;;  %1040 = vmatmul.mubr.msk.bf16.vlgmr.msra.gmra.mxu1 %vm318_vm4, %v1169_v13  ;;  %v444_v35 = vor.u32 %v443_v28, %v439_v21  ;;  %v591_v42 = vand.u32 %v993_v26, %v1434_v4  ;;  %v651_v43 = vand.u32 %v997_v34, %v1434_v4  ;;  %v1176_v44 = vld [vmem:[%s1416_s28 + $0x8] ss:$0 sps:$4 sm:$0x33]   ;;  %v584_v46 = vrot.slane %v994_v38, 1  ;;  %v1001_v50 = vld [vmem:[%s1432_s13 + $0xc] sm:$0x3] }
  0x30   : > { %1044 = vmatpush3.bf16.msra.mxu0 %v454_v15  ;;  %1050 = vmatpush3.bf16.msra.mxu1 %v530_v16  ;;  %v519_v36 = vrot.slane %v517_v31, 1  ;;  %v524_v37 = vrot.slane %v522_v33, 1  ;;  %v585_v47 = vrot.slane %v1171_v18, 1  ;;  %v644_v48 = vrot.slane %v998_v39, 1 }
  0x31   : > { %1045 = vmatprep.mubr.msk.bf16.mxu0 %vm1290_vm3, %v1288_v1  ;;  %1051 = vmatprep.mubr.msk.bf16.mxu1 %vm1290_vm3, %v1288_v1  ;;  %v449_v40 = vsel %vm437_vm5, %v444_v35, %v448_v29  ;;  %v645_v49 = vrot.slane %v1173_v25, 1  ;;  %v706_v51 = vshrl.u32 %v994_v38, 16  ;;  %v709_v52 = vshll.u32 %v994_v38, 16  ;;  %v771_v35 = vld [vmem:[#allocation2] sm:$0xff] }
  0x32   : > { %1055 = vmatprep.subr.bf16.mxu0 %v1288_v1  ;;  %1061 = vmatprep.subr.bf16.mxu1 %v1288_v1  ;;  %v520_v41 = vor.u32 %v519_v36, %v515_v30  ;;  %v714_v53 = vshrl.u32 %v1176_v44, 16  ;;  %v717_v54 = vshll.u32 %v1176_v44, 16  ;;  %v586_v55 = vsel %vm583_vm6, %v584_v46, %v585_v47 }
  0x33   : > { %v646_v56 = vsel %vm583_vm6, %v644_v48, %v645_v49  ;;  %v726_v57 = vand.u32 %v1001_v50, %v1434_v4  ;;  %v708_v58 = vrot.slane %v706_v51, 1  ;;  %v711_v59 = vrot.slane %v709_v52, 2 }
  0x34   : > { %v525_v45 = vsel %vm437_vm5, %v520_v41, %v524_v37  ;;  %v716_v60 = vrot.slane %v714_v53, 1  ;;  %v719_v61 = vrot.slane %v717_v54, 2  ;;  %vm704_vm7 = vsmask.f32 6400  ;;  %v772_v41 = vld [vmem:[#allocation2 + $0x8] sm:$0xff] }
  0x35   : > { %v712_v62 = vor.u32 %v711_v59, %v708_v58  ;;  %vm775_vm8 = vcmask 523264  }
  0x36   : > { %v720_v63 = vor.u32 %v719_v61, %v716_v60 }
  0x37   : > { %1046 = vmatmul.mubr.msk.bf16.vlgmr.msra.gmra.mxu0 %vm318_vm4, %v449_v40  ;;  %1052 = vmatmul.mubr.msk.bf16.vlgmr.msra.gmra.mxu1 %vm318_vm4, %v525_v45 }
  0x38   : > { %1056 = vmatpush3.bf16.msra.mxu0 %v591_v42  ;;  %1062 = vmatpush3.bf16.msra.mxu1 %v651_v43  ;;  %v721_v0 = vsel %vm704_vm7, %v712_v62, %v720_v63 }
  0x39   : > { %1057 = vmatprep.mubr.msk.bf16.mxu0 %vm1290_vm3, %v1288_v1  ;;  %1063 = vmatprep.mubr.msk.bf16.mxu1 %vm1290_vm3, %v1288_v1 }
  0x3a   : > { %1067 = vmatprep.subr.bf16.mxu0 %v1288_v1 }
  0x3f   : > { %1058 = vmatmul.mubr.msk.bf16.vlgmr.msra.gmra.mxu0 %vm318_vm4, %v586_v55  ;;  %1064 = vmatmul.mubr.msk.bf16.vlgmr.msra.gmra.mxu1 %vm318_vm4, %v646_v56 }
  0x40   : > { %1068 = vmatpush3.bf16.msra.mxu0 %v726_v57  ;;  %1069 = vmatprep.mubr.msk.bf16.mxu0 %vm1290_vm3, %v1288_v1 }
  0x47   : > { %1070 = vmatmul.mubr.msk.bf16.vlgmr.msra.gmra.mxu0 %vm318_vm4, %v721_v0 }
  0xef   : > { %v363_v2 = vpop.f32.mrf.mxu0  ;;  %v415_v3 = vpop.f32.mrf.mxu1 }
  0xf0   : > { %v416_v14 = vadd.f32 %v415_v3, %v363_v2 }
  0xf1   : > { %v1035_v4 = vpop.f32.mrf.mxu0  ;;  %v1041_v5 = vpop.f32.mrf.mxu1 }
  0xf3   : > { %v366_v6 = vpop.f32.mrf.mxu0  ;;  %v418_v7 = vpop.f32.mrf.mxu1 }
  0xf4   : > { %v419_v19 = vadd.f32 %v418_v7, %v366_v6 }
  0xf5   : > { %v1036_v8 = vpop.f32.mrf.mxu0  ;;  %v1042_v9 = vpop.f32.mrf.mxu1 }
  0xf7   : > { %v490_v10 = vpop.f32.mrf.mxu0  ;;  %v566_v11 = vpop.f32.mrf.mxu1 }
  0xf8   : > { %v497_v16 = vadd.f32 %v490_v10, %v416_v14 }
  0xf9   : > { %v1047_v12 = vpop.f32.mrf.mxu0  ;;  %v1053_v13 = vpop.f32.mrf.mxu1 }
  0xfa   : > { %v573_v22 = vadd.f32 %v566_v11, %v497_v16 }
  0xfb   : > { %v493_v1 = vpop.f32.mrf.mxu0  ;;  %v569_v15 = vpop.f32.mrf.mxu1 }
  0xfc   : > { %v498_v23 = vadd.f32 %v493_v1, %v419_v19 }
  0xfd   : > { %v1048_v17 = vpop.f32.mrf.mxu0  ;;  %v1054_v18 = vpop.f32.mrf.mxu1 }
  0xfe   : > { %v574_v29 = vadd.f32 %v569_v15, %v498_v23 }
  0xff   : > { %v627_v20 = vpop.f32.mrf.mxu0  ;;  %v687_v21 = vpop.f32.mrf.mxu1 }
 0x100   : > { %v634_v26 = vadd.f32 %v627_v20, %v573_v22 }
 0x101   : > { %v1059_v24 = vpop.f32.mrf.mxu0  ;;  %v1065_v25 = vpop.f32.mrf.mxu1 }
 0x102   : > { %v694_v32 = vadd.f32 %v687_v21, %v634_v26 }
 0x103   : > { %v630_v27 = vpop.f32.mrf.mxu0  ;;  %v690_v28 = vpop.f32.mrf.mxu1 }
 0x104   : > { %v635_v33 = vadd.f32 %v630_v27, %v574_v29 }
 0x105   : > { %v1060_v30 = vpop.f32.mrf.mxu0  ;;  %v1066_v31 = vpop.f32.mrf.mxu1 }
 0x106   : > { %v695_v38 = vadd.f32 %v690_v28, %v635_v33 }
 0x107   : > { %v762_v34 = vpop.f32.mrf.mxu0 }
 0x108   : > { %v769_v36 = vadd.f32 %v762_v34, %v694_v32 }
 0x109   : > { %v1071_v37 = vpop.f32.mrf.mxu0 }
 0x10a   : > { %v773_v39 = vadd.f32 %v771_v35, %v769_v36 }
 0x10b   : > { %v765_v40 = vpop.f32.mrf.mxu0 }
 0x10c   : > { %776 = vst.msk [vmem:[#allocation2] sm:$0xff] %vm775_vm8, %v773_v39  ;;  %v770_v42 = vadd.f32 %v765_v40, %v695_v38  ;;  %781 = sbr.rel (%p1004_p2) target bundleno = 287 (0x11f), region = 44 }
 0x10d   : > { %v1072_v43 = vpop.f32.mrf.mxu0 }
 0x10e   : > { %v774_v44 = vadd.f32 %v772_v41, %v770_v42 }
 0x110   : > { %777 = vst.msk [vmem:[#allocation2 + $0x8] sm:$0xff] %vm775_vm8, %v774_v44 }
 0x111   : > { %v1005_v46 = vld [vmem:[%s1570_s3] ss:$0 sm:$0xff]  ;;  %vm803_vm9 = vcmask 519168  }
 0x113   : > { %v782_v45 = vld [vmem:[#allocation2] sm:$0xff] }
 0x114   : > { %v791_v48 = vadd.f32 %v1005_v46, %v782_v45 }
 0x116   : > { %v793_v50 = vmax.f32 %v791_v48, 0.0 }
 0x117   : > { %v783_v47 = vld [vmem:[#allocation2 + $0x8] sm:$0xff] }
 0x118   : > { %v792_v49 = vadd.f32 %v1005_v46, %v783_v47  ;;  %v1015_v52 = vpack.c.bf16 %v793_v50, %v793_v50 }
 0x11a   : > { %v794_v51 = vmax.f32 %v792_v49, 0.0  ;;  %804 = vst.msk [vmem:[%s1423_s11] sm:$0xf] %vm803_vm9, %v1015_v52 }
 0x11c   : > { %v1016_v53 = vpack.c.bf16 %v794_v51, %v794_v51 }
 0x11e   : > { %805 = vst.msk [vmem:[%s1423_s11 + $0x4] sm:$0xf] %vm803_vm9, %v1016_v53 }
 0x11f PF: > { %s1010_s18 = sshll.u32 %s1269_s20, 5  ;;  %s822_s25 = sshll.u32 %s1423_s11, 4  ;;  %s1501_s25 = int_to_ptr.vmem [resolvable:$true] %s822_s25 }
 0x120   : > { %s819_s14 = sadd.s32 %s1010_s18, %s970_s12  ;;  %s1584_s9 = sand.u32 1, %s1253_s16  }
 0x121   : > { %s1011_s26 = sshll.u32 %s819_s14, 6  ;;  %s1510_s29 = scalar_lea.sflag [#allocation4], %s1584_s9 }
 0x122   : > { %s1506_s8 = scalar_lea.hbm %s1571_s4, %s1011_s26  ;;  %s1177_s23 = scalar_lea.vmem %s1501_s25, 128 }
 0x123   : > { %p1178_p3 = scmp.ne.s32.totalorder %s1501_s25, %s1177_s23  ;;  %s1291_s19 = smov [#allocation3]  }
 0x124   : > { %s1181_s20 = sshll.u32 %s1291_s19, 4  ;;  %s1182_s20 = int_to_ptr.vmem [resolvable:$false] %s1181_s20 }
 0x125   : > { %p1179_p4 = pnand %p1178_p3, %p1381_p6  ;;  %s1183_s11 = scalar_lea.vmem %s1182_s20, 256 }
 0x126   : > { %p1184_p8 = scmp.lt.s32.totalorder %s1501_s25, %s1182_s20  ;;  %p1185_p9 = scmp.lt.s32.totalorder %s1183_s11, %s1177_s23 }
 0x127   : > { %p1180_p5 = pneg %p1179_p4 }
 0x128   : > { %p1186_p10 = por %p1185_p9, %p1184_p8 }
 0x12a   : > { %p1187_p11 = pnand %p1186_p10, %p1180_p5 }
 0x12c   : > { %1190 = shalt.err (!%p1187_p11)
}
 0x12d   : > { %s1191_s12 = scalar_lea.hbm %s1506_s8, 128  ;;  %s1195_s22 = scalar_lea.hbm %s1571_s4, 4096 }
 0x12e   : > { %p1192_p12 = scmp.ne.s32.totalorder %s1506_s8, %s1191_s12  ;;  %p1196_p1 = scmp.lt.s32.totalorder %s1506_s8, %s1571_s4 }
 0x12f   : > { %p1197_p2 = scmp.lt.s32.totalorder %s1195_s22, %s1191_s12 }
 0x130   : > { %p1193_p13 = pnand %p1192_p12, %p1381_p6 }
 0x131   : > { %p1198_p3 = por %p1197_p2, %p1196_p1 }
 0x132   : > { %p1194_p0 = pneg %p1193_p13 }
 0x134   : > { %p1199_p4 = pnand %p1198_p3, %p1194_p0 }
 0x136   : > { %1202 = shalt.err (!%p1199_p4)
}
 0x137   : > { %s1292_s14 = smov 64   ;;  %s1293_s26 = smov 4  }
 0x138   : > { %1075 = dma.vmem_to_hbm [thread:$0]  (%p1381_p6), %s1501_s25, 128, %s1506_s8, %s1510_s29, %s1292_s14, %s1292_s14, %s1293_s26  }
 0x139 PF: > { %p1081_p5 = scmp.ge.s32.totalorder %s1285_s24, 2  ;;  %s837_s6 = sand.u32 1, %s1249_s15  }
 0x13a   : > { %s838_s7 = scalar_lea.sflag [#allocation4], %s837_s6 }
 0x13b   : > { %p1078_p8 = pnand %p1081_p5, %p1388_p7 }
 0x13d   : > { %p1079_p9 = pneg %p1078_p8 }
 0x13f   : > { %1244 = dma.done.wait (%p1079_p9), %s838_s7, 128  }
 0x140   : > { %1246 = vsyncadd (%p1079_p9), %s838_s7, 4294967168  ;;  %s17_s24 = sadd.s32 1, %s1285_s24   ;;  %s1585_s19 = sld [smem:[#allocation6_spill]] }
 0x141   : > { %p14_p10 = scmp.ge.s32.totalorder %s17_s24, 226   ;;  %s1586_s20 = sld [smem:[#allocation7_spill]] }
 0x142   : > { %s1587_s30 = sld [smem:[#allocation8_spill]]  ;;  %s1590_s15 = smov %s1253_s16 }
 0x143   : > { %s1588_s22 = sld [smem:[#allocation9_spill]]  ;;  %s1591_s16 = smov %s1257_s17 }
 0x144   : > { %s1589_s23 = sld [smem:[#allocation10_spill]]  ;;  %s1592_s17 = smov %s1402_s10 }
 0x145   : > { %s1593_s18 = smov %s1273_s21  ;;  %16 = sbr.rel (!%p14_p10) target bundleno = 6 (0x6), region = 89 }
 0x148   : > { %s1594_s21 = smov %s1587_s30 }
 0x14a   :  { %843 = vsyncpa [#allocation4], 1 }
 0x14b   :  { %845 = vsyncpa [#allocation4 + $0x1], 1 }

</bundles_post_ra>
